<compile_context>
chip_gen: v5e
topology: v5e:2x2
jax: 0.10.0
libtpu: 0.0.40
codegen_flags: <defaults>
</compile_context>

<pallas_src>
import numpy as np
import jax
import jax.numpy as jnp
from jax import lax
from jax.experimental import pallas as pl
from jax.experimental.pallas import tpu as pltpu


# ---------------------------------------------------------------------------
# Parameter-matrix construction (host-side glue)
# ---------------------------------------------------------------------------
def bilinear_matrix(out_size: int, in_size: int) -> np.ndarray:
    """Row-stochastic matrix M (out, in): y = M @ x reproduces PyTorch
    F.interpolate(mode='bilinear', align_corners=False) along one axis."""
    scale = in_size / out_size
    m = np.zeros((out_size, in_size), dtype=np.float32)
    for i in range(out_size):
        src = (i + 0.5) * scale - 0.5
        src = max(src, 0.0)                      # PyTorch clamps negative coords to 0
        i0 = min(int(np.floor(src)), in_size - 1)
        i1 = min(i0 + 1, in_size - 1)
        lam = src - i0
        m[i, i0] += 1.0 - lam
        m[i, i1] += lam
    return m


def shift_matrices(n: int) -> np.ndarray:
    """S[k] (n, n) with S[k][i, i + k - 1] = 1 (zero outside range): (S[k] @ X)[i] = X[i + k - 1]
    with zero padding (conv pad = 1)."""
    return np.stack([np.eye(n, n, k=k - 1, dtype=np.float32) for k in range(3)])


# ---------------------------------------------------------------------------
# Pallas kernel: the whole (upsample + concat + 3x3 conv + bias + ReLU) is one matmul.
# ---------------------------------------------------------------------------
def upconv_bn_relu_kernel(x_ref, w_ref, b_ref, o_ref):
    # x_ref: (bm, K)        bf16 folded input slab: [ x1 (parity,kh) H-interp views | x2 (parity,kh) shifts ]
    # w_ref: (K, 2*Wo*Cout) bf16 folded conv weights (kw taps + W-interp + channel mix pre-folded)
    # b_ref: (1, 2*Wo*Cout) f32  bias tiled over W and both row-parity lane blocks
    # o_ref: (bm, 2*Wo*Cout) f32 lane-dense folded output (unmasked >=128-lane store)
    acc = jnp.dot(x_ref[...], w_ref[...], preferred_element_type=jnp.float32)
    o_ref[...] = jnp.maximum(acc + b_ref[...], 0.0).astype(o_ref.dtype)


# ---------------------------------------------------------------------------
# Wrapper: NCHW in / NCHW out
# ---------------------------------------------------------------------------
def upconv_bn_relu(x1, x2, conv_w, conv_b):
    """x1: (N, C1, Hi, Wi), x2: (N, C2, Ho, Wo), conv_w: (Cout, C1+C2, 3, 3), conv_b: (Cout,).
    Returns (N, Cout, Ho, Wo) == relu(conv(cat([bilinear_up(x1, size=(Ho,Wo)), x2], 1)))."""
    n, c1, hi, wi = x1.shape
    n2, c2, ho, wo = x2.shape
    cout, cin, kh_, kw_ = conv_w.shape
    assert n2 == n and cin == c1 + c2 and kh_ == 3 and kw_ == 3
    assert ho % 2 == 0, "lane-folded output layout needs an even output height"
    hop = ho // 2

    f32, bf16 = jnp.float32, jnp.bfloat16
    kt = 6 * (wi * c1 + wo * c2)          # matmul K (x1 views ++ x2 views)
    nl = 2 * wo * cout                    # matmul N (even/odd output rows side by side)

    # ---- input slab construction (layout plumbing + ~6 KFLOP H-interp), zero kernel cost ----
    x1f = jnp.transpose(x1, (0, 2, 3, 1)).reshape(n, hi, wi * c1).astype(f32)
    x2f = jnp.transpose(x2, (0, 2, 3, 1)).reshape(n, ho, wo * c2).astype(bf16)   # bf16 before pad/stack

    whj = jnp.asarray(bilinear_matrix(ho, hi))               # (Ho, Hi)   H bilinear
    wwj = jnp.asarray(bilinear_matrix(wo, wi))               # (Wo, Wi)   W bilinear
    srj = jnp.asarray(shift_matrices(ho))                    # (3, Ho, Ho) H conv shifts
    scj = jnp.asarray(shift_matrices(wo))                    # (3, Wo, Wo) W conv shifts

    # x1 branch: all three (kh-shift @ H-bilinear) views, computed once in f32, cast to bf16 once.
    w_h = jnp.stack([srj[kh] @ whj for kh in range(3)])      # (3, Ho, Hi)
    u = jnp.einsum('khi,biq->bhkq', w_h, x1f)                # (N, Ho, 3, Wi*C1) f32
    x1fold = u.reshape(n, hop, 6 * wi * c1).astype(bf16)     # lanes = (parity j, kh, Wi*C1)

    # x2 branch: kh-shifted copies (conv pad=1 along H), folded onto lanes (parity j, kh, Wo*C2).
    x2_m1 = jnp.pad(x2f, ((0, 0), (1, 0), (0, 0)))[:, :ho]   # row i -> x2f[i-1]
    x2_p1 = jnp.pad(x2f, ((0, 0), (0, 1), (0, 0)))[:, 1:]    # row i -> x2f[i+1]
    x2sh = jnp.stack([x2_m1, x2f, x2_p1], axis=2)            # (N, Ho, 3, Wo*C2)
    x2fold = x2sh.reshape(n, hop, 6 * wo * c2)

    slab = jnp.concatenate([x1fold, x2fold], axis=-1).reshape(n * hop, kt)   # (N*Hop, K) bf16

    # ---- weight folding (host/wrapper side) ----
    w32 = conv_w.astype(f32)
    w1 = w32[:, :c1]                                         # (Cout, C1, 3, 3)  up(x1) taps
    w2 = w32[:, c1:]                                         # (Cout, C2, 3, 3)  x2 taps
    eye2 = jnp.eye(2, dtype=f32)

    # x1 branch weights: B1[kh] folds W-interp + kw-shift + channel mix into the right matmul.
    b1 = [sum(jnp.kron((scj[kw] @ wwj).T, w1[:, :, kh, kw].T) for kw in range(3))
          for kh in range(3)]                                # each (Wi*C1, Wo*Cout)
    b1cat = jnp.kron(eye2, jnp.concatenate(b1, axis=0))      # (6*Wi*C1, 2*Wo*Cout)

    # x2 branch weights: A2[kh] folds kw-shift + channel mix; parity blocks are block-diagonal.
    a2 = [sum(jnp.kron(scj[kw].T, w2[:, :, kh, kw].T) for kw in range(3)) for kh in range(3)]
    a2fold = jnp.kron(eye2, jnp.concatenate(a2, axis=0))     # (6*Wo*C2, 2*Wo*Cout)

    wslab = jnp.concatenate([b1cat, a2fold], axis=0).astype(bf16)            # (K, 2*Wo*Cout)
    bias_fold = jnp.tile(jnp.tile(conv_b.astype(f32), wo), 2).reshape(1, nl)  # (1, 2*Wo*Cout)

    # ---- grid: batch folded into M; 2-way parallel split (v7x megacore) only when each step
    #      still gets >= 16 rows (a full bf16 sublane tile). ----
    total_m = n * hop
    num_steps = 2 if (total_m >= 32 and total_m % 16 == 0) else 1
    bm = total_m // num_steps
    # NOTE: at real UNet sizes also cap bm so (slab + weight + output) x 2 pipeline buffers stays
    # inside scoped VMEM (set pltpu.CompilerParams(vmem_limit_bytes=...) when scaling up).

    out_fold = pl.pallas_call(
        upconv_bn_relu_kernel,
        out_shape=jax.ShapeDtypeStruct((total_m, nl), f32),
        grid_spec=pltpu.PrefetchScalarGridSpec(
            num_scalar_prefetch=0,
            grid=(num_steps,),
            in_specs=[
                pl.BlockSpec((bm, kt), lambda i: (i, 0)),
                pl.BlockSpec((kt, nl), lambda i: (0, 0)),
                pl.BlockSpec((1, nl), lambda i: (0, 0)),
            ],
            out_specs=pl.BlockSpec((bm, nl), lambda i: (i, 0)),
        ),
        compiler_params=pltpu.CompilerParams(dimension_semantics=("parallel",)),
    )(slab, wslab, bias_fold)

    # Unpack lane-folded output: (N*Hop, 2*Wo*Cout) -> NCHW (pure layout plumbing).
    out = out_fold.reshape(n, hop, 2, wo, cout).reshape(n, ho, wo, cout)
    return jnp.transpose(out, (0, 3, 1, 2))


# ---------------------------------------------------------------------------
# Pure-JAX reference (f32, same math as the PyTorch module) for a correctness check
# ---------------------------------------------------------------------------
def reference(x1, x2, conv_w, conv_b):
    hi, wi = x1.shape[2:]
    ho, wo = x2.shape[2:]
    wh = jnp.asarray(bilinear_matrix(ho, hi))
    ww = jnp.asarray(bilinear_matrix(wo, wi))
    x1_up = jnp.einsum('hp,ncpq,wq->nchw', wh, x1.astype(jnp.float32), ww)
    xin = jnp.concatenate([x1_up, x2.astype(jnp.float32)], axis=1)
    out = lax.conv_general_dilated(
        xin, conv_w.astype(jnp.float32), window_strides=(1, 1),
        padding=((1, 1), (1, 1)),
        dimension_numbers=('NCHW', 'OIHW', 'NCHW'))
    out = out + conv_b.astype(jnp.float32)[None, :, None, None]
    return jnp.maximum(out, 0.0)


if __name__ == "__main__":
    # Module config: UpConvBNReLU(in_ch=4, out_ch=4, kernel_size=3, dilation=1, flag=True)
    N, C1, C2, COUT = 2, 2, 2, 4
    HI, WI, HO, WO = 8, 8, 16, 16

    key = jax.random.PRNGKey(0)
    k1, k2, k3, k4 = jax.random.split(key, 4)
    x1 = jax.random.normal(k1, (N, C1, HI, WI), dtype=jnp.float32)
    x2 = jax.random.normal(k2, (N, C2, HO, WO), dtype=jnp.float32)
    conv_w = jax.random.normal(k3, (COUT, C1 + C2, 3, 3), dtype=jnp.float32) * 0.1
    conv_b = jax.random.normal(k4, (COUT,), dtype=jnp.float32) * 0.1

    out = jax.block_until_ready(upconv_bn_relu(x1, x2, conv_w, conv_b))
    ref = jax.block_until_ready(reference(x1, x2, conv_w, conv_b))

    assert out.shape == (N, COUT, HO, WO), out.shape
    # bf16 MXU operands (f32 accumulation) -> looser tolerance than an all-f32 version.
    max_err = float(jnp.max(jnp.abs(out - ref)))
    assert max_err < 6e-2, f"mismatch vs reference: {max_err}"
    print("KERNEL_OK")
</pallas_src>

<mosaic_0001>
module attributes {stable_mosaic.version = 11 : i64} {
  func.func @upconv_bn_relu_kernel(%arg0: i32, %arg1: memref<16x288xbf16, #tpu.memory_space<vmem>>, %arg2: memref<288x128xbf16, #tpu.memory_space<vmem>>, %arg3: memref<1x128xf32, #tpu.memory_space<vmem>>, %arg4: memref<16x128xf32, #tpu.memory_space<vmem>>) attributes {dimension_semantics = [#tpu.dimension_semantics<parallel>], iteration_bounds = array<i64: 1>, scalar_prefetch = 0 : i64, scratch_operands = 0 : i64, tpu.core_type = #tpu.core_type<tc>, window_params = [{transform_indices = @transform_0, window_bounds = array<i64: 16, 288>}, {pipeline_mode = #tpu.pipeline_mode<synchronous>, transform_indices = @transform_1, window_bounds = array<i64: 288, 128>}, {pipeline_mode = #tpu.pipeline_mode<synchronous>, transform_indices = @transform_2, window_bounds = array<i64: 1, 128>}, {transform_indices = @transform_3, window_bounds = array<i64: 16, 128>}]} {
    %c0 = arith.constant 0 : index
    %c0_0 = arith.constant 0 : index
    %0 = vector.load %arg1[%c0, %c0_0] : memref<16x288xbf16, #tpu.memory_space<vmem>>, vector<16x288xbf16>
    %c0_1 = arith.constant 0 : index
    %c0_2 = arith.constant 0 : index
    %1 = vector.load %arg2[%c0_1, %c0_2] : memref<288x128xbf16, #tpu.memory_space<vmem>>, vector<288x128xbf16>
    %cst = arith.constant dense<0.000000e+00> : vector<16x128xf32>
    %2 = tpu.matmul %0, %1, %cst {dimension_numbers = #tpu.dot_dimension_numbers<[1], [0], [0], [1], [0, 0, 1, 1], [], []>} : vector<16x288xbf16>, vector<288x128xbf16>, vector<16x128xf32> -> vector<16x128xf32>
    %c0_3 = arith.constant 0 : index
    %c0_4 = arith.constant 0 : index
    %3 = vector.load %arg3[%c0_3, %c0_4] : memref<1x128xf32, #tpu.memory_space<vmem>>, vector<1x128xf32>
    %4 = vector.broadcast %3 : vector<1x128xf32> to vector<16x128xf32>
    %5 = arith.addf %2, %4 : vector<16x128xf32>
    %cst_5 = arith.constant 0.000000e+00 : f32
    %6 = vector.broadcast %cst_5 : f32 to vector<16x128xf32>
    %7 = arith.maximumf %5, %6 : vector<16x128xf32>
    %c0_6 = arith.constant 0 : index
    %c0_7 = arith.constant 0 : index
    %8 = vector.load %arg4[%c0_6, %c0_7] : memref<16x128xf32, #tpu.memory_space<vmem>>, vector<16x128xf32>
    tpu.vector_store %arg4[%c0_6, %c0_7], %7 {strides = array<i32>} : memref<16x128xf32, #tpu.memory_space<vmem>>, vector<16x128xf32>,
    return
  }
  func.func @transform_0(%arg0: i32) -> (i32, i32) {
    %c0_i32 = arith.constant 0 : i32
    %c0_i32_0 = arith.constant 0 : i32
    return %arg0, %c0_i32 : i32, i32
  }
  func.func @transform_1(%arg0: i32) -> (i32, i32) {
    %c0_i32 = arith.constant 0 : i32
    %c0_i32_0 = arith.constant 0 : i32
    %c0_i32_1 = arith.constant 0 : i32
    return %c0_i32, %c0_i32_0 : i32, i32
  }
  func.func @transform_2(%arg0: i32) -> (i32, i32) {
    %c0_i32 = arith.constant 0 : i32
    %c0_i32_0 = arith.constant 0 : i32
    %c0_i32_1 = arith.constant 0 : i32
    return %c0_i32, %c0_i32_0 : i32, i32
  }
  func.func @transform_3(%arg0: i32) -> (i32, i32) {
    %c0_i32 = arith.constant 0 : i32
    %c0_i32_0 = arith.constant 0 : i32
    return %arg0, %c0_i32 : i32, i32
  }
}

</mosaic_0001>

<bundles_post_ra>
// kernel: tpu_custom_call.1
= control target key start
LH: loop header
LB: loop body
LE: loop exit
PB: predicated region body
PF: predicated region fallthrough
CT: control target
= control target key end

     0   :  { %8 = vsyncpa [#allocation3], 0  ;;  %s520_s0 = inlined_call_operand.hbm [shape: bf16[16,288], index: 0, kind: input, shape index: {}]   ;;  %s521_s1 = inlined_call_operand.hbm [shape: bf16[288,128], index: 1, kind: input, shape index: {}]   ;;  %s522_s2 = inlined_call_operand.vmem [shape: f32[1,128], index: 2, kind: input, shape index: {}]   ;;  %s523_s3 = inlined_call_operand.hbm [shape: f32[16,128], index: 3, kind: output, shape index: {}]  }
   0x1   :  { %9 = vsyncpa [#allocation6], 0 }
   0x2   :  { %10 = vsyncpa [#allocation4], 0  ;;  %s15_s14 = sshll.u32 %s520_s0, 4  ;;  %s479_s15 = smov [#allocation2]   ;;  %s16_s14 = int_to_ptr.hbm [resolvable:$true] %s15_s14 }
   0x3   :  { %s17_s16 = sshll.u32 %s479_s15, 4  ;;  %s28_s19 = sshll.u32 %s521_s1, 4  ;;  %s18_s16 = int_to_ptr.vmem [resolvable:$true] %s17_s16  ;;  %s29_s19 = int_to_ptr.hbm [resolvable:$true] %s28_s19 }
   0x4   :  { %s480_s20 = smov 192   ;;  %s481_s21 = smov 12  }
   0x5   :  { %23 = dma.hbm_to_vmem [thread:$0]  %s16_s14, 384, %s18_s16, [#allocation3], %s480_s20, %s480_s20, %s481_s21  }
   0x6   :  { %s482_s22 = smov [#allocation5]   ;;  %s483_s24 = smov 64  }
   0x7   :  { %s30_s23 = sshll.u32 %s482_s22, 4  ;;  %s484_s25 = smov 4   ;;  %s31_s23 = int_to_ptr.vmem [resolvable:$true] %s30_s23 }
   0x8   :  { %36 = dma.hbm_to_vmem [thread:$0]  %s29_s19, 2304, %s31_s23, [#allocation6], %s483_s24, %s483_s24, %s484_s25  }
   0x9   :  { %473 = dma.done.wait [#allocation3], 384  }
   0xa   :  { %474 = vsyncadd [#allocation3], 4294966912 }
   0xb   :  { %475 = dma.done.wait [#allocation6], 2304  }
   0xc   :  { %476 = vsyncadd [#allocation6], 4294964992  ;;  %v380_v0 = vld [vmem:[#allocation5 + $0x38] sm:$0xff]  ;;  %v379_v2 = vld [vmem:[#allocation5 + $0x30] sm:$0xff]  ;;  %vm215_vm0 = vcmask 261120   ;;  %s485_s26 = smov [#allocation7]  }
   0xd   :  { %v388_v1 = vld [vmem:[#allocation5 + $0x78] sm:$0xff]  ;;  %219 = vmatpush.bf16.msra.mxu0 %v380_v0  ;;  %v387_v3 = vld [vmem:[#allocation5 + $0x70] sm:$0xff]  ;;  %v390_v4 = vld [vmem:[#allocation5 + $0x88] sm:$0xff]  ;;  %s269_s27 = sshll.u32 %s485_s26, 4  ;;  %s271_s30 = sshll.u32 %s523_s3, 4  ;;  %s270_s27 = int_to_ptr.vmem [resolvable:$true] %s269_s27  ;;  %s272_s30 = int_to_ptr.hbm [resolvable:$true] %s271_s30 }
   0xe   :  { %233 = vmatpush.bf16.msra.mxu1 %v388_v1  ;;  %253 = vmatpush.bf16.msra.mxu2 %v390_v4  ;;  %v389_v5 = vld [vmem:[#allocation5 + $0x80] sm:$0xff]  ;;  %v295_v6 = vld [vmem:[#allocation2 + $0x8] sm:$0xf]  ;;  %v372_v7 = vld [vmem:[#allocation2 + $0x10] sm:$0xf0]  ;;  %s487_s4 = smov 8  }
   0xf   :  { %v378_v8 = vld [vmem:[#allocation5 + $0x28] sm:$0xff]  ;;  %v296_v10 = vor.u32 %v372_v7, %v295_v6  ;;  %v377_v11 = vld [vmem:[#allocation5 + $0x20] sm:$0xff]  ;;  %v376_v13 = vld [vmem:[#allocation5 + $0x18] sm:$0xff] }
  0x10   :  { %v386_v9 = vld [vmem:[#allocation5 + $0x68] sm:$0xff]  ;;  %v385_v12 = vld [vmem:[#allocation5 + $0x60] sm:$0xff]  ;;  %v384_v14 = vld [vmem:[#allocation5 + $0x58] sm:$0xff] }
  0x11   :  { %220 = vmatpush.bf16.msra.mxu0 %v379_v2  ;;  %v375_v15 = vld [vmem:[#allocation5 + $0x10] sm:$0xff]  ;;  %v374_v17 = vld [vmem:[#allocation5 + $0x8] sm:$0xff]  ;;  %v373_v19 = vld [vmem:[#allocation5] sm:$0xff] }
  0x12   :  { %234 = vmatpush.bf16.msra.mxu1 %v387_v3  ;;  %254 = vmatpush.bf16.msra.mxu2 %v389_v5  ;;  %v383_v16 = vld [vmem:[#allocation5 + $0x50] sm:$0xff]  ;;  %v382_v18 = vld [vmem:[#allocation5 + $0x48] sm:$0xff]  ;;  %v381_v20 = vld [vmem:[#allocation5 + $0x40] sm:$0xff] }
  0x13   :  { %v287_v21 = vld [vmem:[#allocation2] sm:$0xf]  ;;  %v371_v22 = vld [vmem:[#allocation2 + $0x8] sm:$0xf0]  ;;  %v370_v23 = vld [vmem:[#allocation2 + $0x4] sm:$0xf] }
  0x14   :  { %v289_v24 = vld [vmem:[#allocation2 + $0xc] sm:$0xf0]  ;;  %v288_v25 = vor.u32 %v371_v22, %v287_v21  ;;  %v400_v27 = vld [vmem:[%s522_s2] ss:$0 sm:$0xff]  ;;  %s486_s2 = smov 128  }
  0x15   :  { %221 = vmatpush.bf16.msra.mxu0 %v378_v8  ;;  %369 = vmatmul.msk.bf16.vlgmr.msra.gmra.mxu2 %vm215_vm0, %v296_v10  ;;  %v292_v26 = vor.u32 %v370_v23, %v289_v24 }
  0x16   :  { %235 = vmatpush.bf16.msra.mxu1 %v386_v9 }
  0x19   :  { %222 = vmatpush.bf16.msra.mxu0 %v377_v11 }
  0x1a   :  { %236 = vmatpush.bf16.msra.mxu1 %v385_v12 }
  0x1d   :  { %223 = vmatpush.bf16.msra.mxu0 %v376_v13 }
  0x1e   :  { %237 = vmatpush.bf16.msra.mxu1 %v384_v14 }
  0x21   :  { %224 = vmatpush.bf16.msra.mxu0 %v375_v15 }
  0x22   :  { %238 = vmatpush.bf16.msra.mxu1 %v383_v16 }
  0x25   :  { %225 = vmatpush.bf16.msra.mxu0 %v374_v17 }
  0x26   :  { %239 = vmatpush.bf16.msra.mxu1 %v382_v18 }
  0x29   :  { %226 = vmatpush.bf16.msra.mxu0 %v373_v19 }
  0x2a   :  { %240 = vmatpush.bf16.msra.mxu1 %v381_v20 }
  0x2c   :  { %227 = vmatmul.bf16.vlgmr.msra.gmra.mxu0 %v288_v25 }
  0x2d   :  { %241 = vmatmul.bf16.vlgmr.msra.gmra.mxu1 %v292_v26 }
  0x98   :  { %v256_v31 = vpop.f32.mrf.mxu2 }
  0xa0   :  { %v258_v39 = vpop.f32.mrf.mxu2 }
  0xa9   :  { %v228_v28 = vpop.f32.mrf.mxu0 }
  0xaa   :  { %v242_v29 = vpop.f32.mrf.mxu1  ;;  %v229_v30 = vadd.f32 %v400_v27, %v228_v28 }
  0xac   :  { %v243_v32 = vadd.f32 %v242_v29, %v229_v30 }
  0xae   :  { %v257_v33 = vadd.f32 %v256_v31, %v243_v32 }
  0xb0   :  { %v261_v34 = vmax.f32 %v257_v33, 0.0 }
  0xb1   :  { %v230_v35 = vpop.f32.mrf.mxu0 }
  0xb2   :  { %263 = vst [vmem:[#allocation7] sm:$0xff] %v261_v34  ;;  %v231_v36 = vadd.f32 %v400_v27, %v230_v35  ;;  %v244_v37 = vpop.f32.mrf.mxu1 }
  0xb4   :  { %v245_v38 = vadd.f32 %v244_v37, %v231_v36 }
  0xb6   :  { %v259_v40 = vadd.f32 %v258_v39, %v245_v38 }
  0xb8   :  { %v262_v41 = vmax.f32 %v259_v40, 0.0 }
  0xba   :  { %264 = vst [vmem:[#allocation7 + $0x8] sm:$0xff] %v262_v41 }
  0xbb   :  { %277 = dma.vmem_to_hbm [thread:$0]  %s270_s27, 256, %s272_s30, [#allocation4], %s486_s2, %s486_s2, %s487_s4  }
  0xbc   :  { %477 = dma.done.wait [#allocation4], 256  }
  0xbd   :  { %478 = vsyncadd [#allocation4], 4294967040 }
  0xbe   :  { %282 = vsyncpa [#allocation3], 1 }
  0xbf   :  { %283 = vsyncpa [#allocation6], 1 }
  0xc0   :  { %284 = vsyncpa [#allocation4], 1 }

</bundles_post_ra>
